<compile_context>
chip_gen: v7x
topology: tpu7x:2x2x1
jax: 0.10.0
libtpu: 0.0.40
codegen_flags: <defaults>
</compile_context>

<pallas_src>
import jax
import jax.numpy as jnp
from jax.experimental import pallas as pl
from jax.experimental.pallas import tpu as pltpu

_LANES = 128


def _softmax_kernel(w_ref, o_ref):
    # w_ref, o_ref: (1, n_pad) float32, fully resident in VMEM.
    w = w_ref[...]
    m = jnp.max(w, axis=-1, keepdims=True)      # numerically-stable softmax
    e = jnp.exp(w - m)                          # padded -inf lanes -> exactly 0
    denom = jnp.sum(e, axis=-1, keepdims=True)
    # Exact divide: the approximate EUP reciprocal (~2^-12 rel. error) made the
    # normalized weights sum to 1 +/- ~1e-3, which is user-visible for a
    # probability simplex.  This kernel is launch-bound, so exact is free.
    o_ref[...] = e / denom


def _softmax_call(w2d: jax.Array) -> jax.Array:
    """Gridless single-tile softmax over the last (lane) axis of a (1, n_pad) row."""
    return pl.pallas_call(
        _softmax_kernel,
        out_shape=jax.ShapeDtypeStruct(w2d.shape, jnp.float32),
        in_specs=[pl.BlockSpec(memory_space=pltpu.MemorySpace.VMEM)],
        out_specs=pl.BlockSpec(memory_space=pltpu.MemorySpace.VMEM),
    )(w2d)


def _pad_to_lane_row(w: jax.Array) -> jax.Array:
    """(N,) -> (1, n_pad) f32 row, n_pad a multiple of 128, padded with -inf."""
    n = w.shape[0]
    n_pad = max(_LANES, ((n + _LANES - 1) // _LANES) * _LANES)
    if w.dtype != jnp.float32:
        w = w.astype(jnp.float32)
    if n_pad != n:
        w = jnp.concatenate([w, jnp.full((n_pad - n,), -jnp.inf, dtype=jnp.float32)])
    return w.reshape(1, n_pad)


def data_weights_forward(source_weights: jax.Array, normalize: bool) -> jax.Array:
    """Functional form of DataWeights.forward().

    source_weights: 1-D float array of shape (N,).
    Returns a 1-D float32 array of shape (N,).
    """
    if not normalize:
        # Identity path: no kernel launch, no HBM round trip.
        return source_weights
    n = source_weights.shape[0]
    out2d = _softmax_call(_pad_to_lane_row(source_weights))
    return out2d[0, :n]


class DataWeights:
    """Thin JAX wrapper mirroring the PyTorch module's constructor/forward."""

    def __init__(self, init_weights, normalize: bool = False):
        self.source_weights = jnp.asarray(init_weights, dtype=jnp.float32)
        self.normalize = normalize
        self._n = self.source_weights.shape[0]
        # Pad/reshape once at init (not per call) to trim wrapper-side dispatches.
        # (If the parameter is updated during training, re-derive this row.)
        self._w2d = _pad_to_lane_row(self.source_weights) if normalize else None

    def __call__(self) -> jax.Array:
        if not self.normalize:
            return self.source_weights
        return _softmax_call(self._w2d)[0, : self._n]


if __name__ == "__main__":
    key = jax.random.PRNGKey(0)

    # Small deterministic parameter vector (analogous to init_weights list).
    n_sources = 8
    init_weights = jax.random.normal(key, (n_sources,), dtype=jnp.float32)

    # normalize=False path: forward returns the parameter unchanged (no kernel).
    m_raw = DataWeights(init_weights, normalize=False)
    out_raw = jax.block_until_ready(m_raw())

    # normalize=True path: forward returns softmax over dim 0 (Pallas kernel).
    m_norm = DataWeights(init_weights, normalize=True)
    out_norm = jax.block_until_ready(m_norm())

    # Reference checks (plain JAX).
    assert out_raw.shape == (n_sources,)
    assert jnp.allclose(out_raw, init_weights, atol=1e-6), "identity path mismatch"
    ref = jax.nn.softmax(init_weights, axis=0)
    assert out_norm.shape == (n_sources,)
    assert jnp.allclose(out_norm, ref, atol=1e-5), "softmax path mismatch"
    assert abs(float(jnp.sum(out_norm)) - 1.0) < 1e-3, "softmax does not sum to 1"

    # Exercise a size that is not a lane multiple (padding path) once as well.
    w2 = jax.random.normal(jax.random.PRNGKey(1), (200,), dtype=jnp.float32)
    out2 = jax.block_until_ready(data_weights_forward(w2, normalize=True))
    assert jnp.allclose(out2, jax.nn.softmax(w2, axis=0), atol=1e-5)
    assert abs(float(jnp.sum(out2)) - 1.0) < 1e-3

    print("KERNEL_OK")
</pallas_src>

<mosaic_0001>
module attributes {stable_mosaic.version = 11 : i64} {
  func.func @_softmax_kernel(%arg0: memref<1x128xf32, #tpu.memory_space<vmem>>, %arg1: memref<1x128xf32, #tpu.memory_space<vmem>>) attributes {dimension_semantics = [], scalar_prefetch = 0 : i64, scratch_operands = 0 : i64, tpu.core_type = #tpu.core_type<tc>} {
    %c0 = arith.constant 0 : index
    %c0_0 = arith.constant 0 : index
    %0 = vector.load %arg0[%c0, %c0_0] : memref<1x128xf32, #tpu.memory_space<vmem>>, vector<1x128xf32>
    %cst = arith.constant dense<0xFF800000> : vector<1xf32>
    %1 = vector.multi_reduction <maximumf>, %0, %cst [1] : vector<1x128xf32> to vector<1xf32>
    %2 = vector.shape_cast %1 : vector<1xf32> to vector<1x1xf32>
    %3 = vector.broadcast %2 : vector<1x1xf32> to vector<1x128xf32>
    %4 = arith.subf %0, %3 : vector<1x128xf32>
    %5 = math.exp %4 : vector<1x128xf32>
    %cst_1 = arith.constant dense<0.000000e+00> : vector<1xf32>
    %6 = vector.multi_reduction <add>, %5, %cst_1 [1] : vector<1x128xf32> to vector<1xf32>
    %7 = vector.shape_cast %6 : vector<1xf32> to vector<1x1xf32>
    %8 = vector.broadcast %7 : vector<1x1xf32> to vector<1x128xf32>
    %9 = arith.divf %5, %8 : vector<1x128xf32>
    %c0_2 = arith.constant 0 : index
    %c0_3 = arith.constant 0 : index
    %10 = vector.load %arg1[%c0_2, %c0_3] : memref<1x128xf32, #tpu.memory_space<vmem>>, vector<1x128xf32>
    tpu.vector_store %arg1[%c0_2, %c0_3], %9 {strides = array<i32>} : memref<1x128xf32, #tpu.memory_space<vmem>>, vector<1x128xf32>,
    return
  }
}

</mosaic_0001>

<bundles_post_ra>
// kernel: tpu_custom_call.1
= control target key start
LH: loop header
LB: loop body
LE: loop exit
PB: predicated region body
PF: predicated region fallthrough
CT: control target
= control target key end

     0   :  { %6 = vsyncpa [#allocation3], 0  ;;  %s140_s0 = inlined_call_operand.hbm [shape: f32[1,128], index: 0, kind: input, shape index: {}]   ;;  %s141_s1 = inlined_call_operand.hbm [shape: f32[1,128], index: 1, kind: output, shape index: {}]  }
   0x1   :  { %7 = vsyncpa [#allocation4], 0  ;;  %s104_s6 = smov [#allocation2]   ;;  %s56_s10 = scalar_lea.hbm %s140_s0, 16 }
   0x2   :  { %s14_s7 = sshll.u32 %s104_s6, 4  ;;  %p57_p0 = scmp.ne.s32.totalorder %s140_s0, %s56_s10  ;;  %s15_s7 = int_to_ptr.vmem [resolvable:$true] %s14_s7 }
   0x3   :  { %p60_p1 = scmp.lt.u32.totalorder %s56_s10, %s140_s0 }
   0x5   :  { %p62_p2 = pnand %p60_p1, %p57_p0 }
   0x7   :  { %65 = shalt.err (!%p62_p2)
}
   0x8   :  { %s66_s15 = scalar_lea.vmem %s15_s7, 16  ;;  %s70_s16 = scalar_lea.vmem %s15_s7, 32 }
   0x9   :  { %p67_p3 = scmp.ne.s32.totalorder %s15_s7, %s66_s15  ;;  %p71_p4 = scmp.lt.s32.totalorder %s15_s7, %s15_s7 }
   0xa   :  { %p72_p5 = scmp.lt.s32.totalorder %s70_s16, %s66_s15 }
   0xc   :  { %p73_p6 = por %p72_p5, %p71_p4 }
   0xe   :  { %p74_p7 = pnand %p73_p6, %p67_p3 }
  0x10   :  { %77 = shalt.err (!%p74_p7)
}
  0x11   :  { %17 = dma.hbm_to_vmem [thread:$0]  %s140_s0, 16, %s15_s7, [#allocation3]  }
  0x12   :  { %100 = dma.done.wait [#allocation3], 16  }
  0x13   :  { %101 = vsyncadd [#allocation3], 4294967280  ;;  %vm22_vm0 = vcmask 1040384   ;;  %v21_v0 = vld [vmem:[#allocation2] sm:$0x1]  ;;  %s105_s19 = smov [#allocation5]  }
  0x14   :  { %v23_v1 = vsel %vm22_vm0, %v21_v0, -inf  ;;  %s41_s20 = sshll.u32 %s105_s19, 4  ;;  %s42_s20 = int_to_ptr.vmem [resolvable:$true] %s41_s20 }
  0x15   :  { %24 = vmax.xlane.f32.xlu0 %v23_v1  ;;  %s78_s0 = scalar_lea.vmem %s42_s20, 16  ;;  %s82_s21 = scalar_lea.vmem %s42_s20, 32 }
  0x16   :  { %p79_p8 = scmp.ne.s32.totalorder %s42_s20, %s78_s0  ;;  %p83_p9 = scmp.lt.s32.totalorder %s42_s20, %s42_s20 }
  0x17   :  { %p84_p10 = scmp.lt.s32.totalorder %s82_s21, %s78_s0 }
  0x19   :  { %p85_p11 = por %p84_p10, %p83_p9 }
  0x1b   :  { %p86_p12 = pnand %p85_p11, %p79_p8 }
  0xa2   :  { %v25_v2 = vpop.xlane.xlu0 %24 }
  0xa3   :  { %v26_v3 = vsub.f32 %v21_v0, %v25_v2 }
  0xa5   :  { %v27_v4 = vmul.f32 1.442695, %v26_v3 }
  0xa7   :  { %52 = vpow2.f32 %v27_v4 }
  0xb1   :  { %v53_v5 = vpop.eup %52 }
  0xb2   :  { %v29_v6 = vsel %vm22_vm0, %v53_v5, 0.0 }
  0xb3   :  { %30 = vadd.xlane.f32.xlu0 %v29_v6 }
 0x140   :  { %v31_v7 = vpop.xlane.xlu0 %30 }
 0x141   :  { %54 = vrcp.f32 %v31_v7 }
 0x14b   :  { %v55_v8 = vpop.eup %54 }
 0x14c   :  { %v33_v9 = vmul.f32 %v55_v8, %v53_v5 }
 0x14e   :  { %34 = vst [vmem:[#allocation5] sm:$0x1] %v33_v9 }
 0x14f   :  { %89 = shalt.err (!%p86_p12)
}
 0x150   :  { %s90_s24 = scalar_lea.hbm %s141_s1, 16 }
 0x151   :  { %p91_p13 = scmp.ne.s32.totalorder %s141_s1, %s90_s24  ;;  %p94_p0 = scmp.lt.u32.totalorder %s90_s24, %s141_s1 }
 0x153   :  { %p96_p1 = pnand %p94_p0, %p91_p13 }
 0x155   :  { %99 = shalt.err (!%p96_p1)
}
 0x156   :  { %44 = dma.vmem_to_hbm [thread:$0]  %s42_s20, 16, %s141_s1, [#allocation4]  }
 0x157   :  { %102 = dma.done.wait [#allocation4], 16  }
 0x158   :  { %103 = vsyncadd [#allocation4], 4294967280 }
 0x159   :  { %48 = vsyncpa [#allocation3], 1 }
 0x15a   :  { %49 = vsyncpa [#allocation4], 1 }

</bundles_post_ra>
